<compile_context>
chip_gen: v7x
topology: tpu7x:2x2x1
jax: 0.10.0
libtpu: 0.0.40
codegen_flags: <defaults>
</compile_context>

<pallas_src>
import functools

import jax
import jax.numpy as jnp
from jax.experimental import pallas as pl
from jax.experimental.pallas import tpu as pltpu


# ---------------------------------------------------------------------------
# helpers
# ---------------------------------------------------------------------------

def _pick_tile(n, candidates):
    """Largest candidate tile that evenly divides n, else the full extent."""
    for c in candidates:
        if n % c == 0:
            return c
    return n


def _round_up(x, m):
    return (x + m - 1) // m * m


def _padded_bytes(shape, itemsize):
    """Rough VMEM footprint of one buffer (last two dims padded to (8, 128))."""
    dims = list(shape)
    dims[-1] = _round_up(dims[-1], 128)
    if len(dims) >= 2:
        dims[-2] = _round_up(dims[-2], 8)
    n = 1
    for d in dims:
        n *= d
    return n * itemsize


def _vmem_limit(block_bytes):
    # Budget: double-buffered working set + headroom, clamped so it also fits
    # inside v7x's 64 MiB physical VMEM (48 MiB cap leaves headroom).
    return int(min(max(2 * block_bytes + (4 << 20), 16 << 20), 48 << 20))


# ---------------------------------------------------------------------------
# kernel 1: fused QKV projection
# ---------------------------------------------------------------------------

def _qkv_proj_kernel(x_ref, w_ref, b_ref, qkv_ref):
    """Fused Q|K|V projection for one row tile.

    x_ref:   (TR, D_in)  f32
    w_ref:   (D_in, 3H)  bf16  (Q columns pre-scaled by 1/sqrt(head_size))
    b_ref:   (1, 3H)     f32
    qkv_ref: (TR, 3H)    bf16
    """
    x = x_ref[...].astype(jnp.bfloat16)                       # bf16 MXU inputs
    acc = jnp.dot(x, w_ref[...], preferred_element_type=jnp.float32)
    qkv_ref[...] = (acc + b_ref[...]).astype(qkv_ref.dtype)   # single bias VPU pass


# ---------------------------------------------------------------------------
# kernel 2: flash attention (online softmax over KV tiles) + mix projection
# ---------------------------------------------------------------------------

def _flash_mix_kernel(q_ref, k_ref, v_ref, wmix_ref, bmix_ref, out_ref,
                      m_sc, l_sc, acc_sc, *, causal):
    """
    q_ref:    (num_heads, TQ,  hs)  bf16  (already scaled by 1/sqrt(hs))
    k_ref:    (num_heads, TKV, hs)  bf16
    v_ref:    (num_heads, TKV, hs)  bf16
    wmix_ref: (num_heads, hs, H)    f32
    bmix_ref: (1, H)                f32
    out_ref:  (TQ, H)               f32   (lane-dense store)
    scratch:  m/l (num_heads, TQ, 1) f32, acc (num_heads, TQ, hs) f32
    """
    num_heads, tq, hs = q_ref.shape
    tkv = k_ref.shape[1]
    qi = pl.program_id(1)
    ki = pl.program_id(2)

    @pl.when(ki == 0)
    def _init():
        m_sc[...] = jnp.full_like(m_sc, -jnp.inf)
        l_sc[...] = jnp.zeros_like(l_sc)
        acc_sc[...] = jnp.zeros_like(acc_sc)

    def _attend():
        q = q_ref[...]
        k = k_ref[...]
        v = v_ref[...]
        # All heads in one batched MXU contraction; softmax math stays in f32.
        s = jnp.einsum('hqd,hkd->hqk', q, k, preferred_element_type=jnp.float32)
        if causal:
            # Tile-local mask from iota (no (S,S) mask materialized in VMEM).
            row = qi * tq + jax.lax.broadcasted_iota(jnp.int32, (num_heads, tq, tkv), 1)
            col = ki * tkv + jax.lax.broadcasted_iota(jnp.int32, (num_heads, tq, tkv), 2)
            s = jnp.where(col > row, jnp.float32(-1e30), s)
        m_prev = m_sc[...]
        m_new = jnp.maximum(m_prev, s.max(axis=-1, keepdims=True))
        alpha = jnp.exp(m_prev - m_new)
        p = jnp.exp(s - m_new)
        l_sc[...] = alpha * l_sc[...] + p.sum(axis=-1, keepdims=True)
        acc_sc[...] = alpha * acc_sc[...] + jnp.einsum(
            'hqk,hkd->hqd', p.astype(v.dtype), v, preferred_element_type=jnp.float32)
        m_sc[...] = m_new

    if causal:
        # Skip KV tiles that lie entirely in the future of this Q tile.
        @pl.when(ki * tkv <= qi * tq + (tq - 1))
        def _():
            _attend()
    else:
        _attend()

    @pl.when(ki == pl.num_programs(2) - 1)
    def _finalize():
        # Normalize with the (free) EUP approx reciprocal, then accumulate the mix
        # projection per head:  out = sum_h att_h @ wmix[h*hs:(h+1)*hs, :] + bmix.
        # This turns the head concat into MXU accumulation and keeps the output
        # store lane-dense (last dim = H).
        att = acc_sc[...] * pl.reciprocal(l_sc[...], approx=True)
        o = jnp.dot(att[0], wmix_ref[0], preferred_element_type=jnp.float32)
        for h in range(1, num_heads):
            o = o + jnp.dot(att[h], wmix_ref[h], preferred_element_type=jnp.float32)
        out_ref[...] = (o + bmix_ref[...]).astype(out_ref.dtype)


# ---------------------------------------------------------------------------
# wrapper
# ---------------------------------------------------------------------------

def multi_head_self_attention(x, params, *, num_heads, causal=False):
    """x: (B, S, D_in) float32 -> (B, S, H) float32."""
    B, S, D_in = x.shape
    wq, bq, wk, bk, wv, bv, wmix, bmix = params
    H = wq.shape[1]
    assert H % num_heads == 0
    hs = H // num_heads
    inv_scale = 1.0 / (hs ** 0.5)

    # ---- weight-only prep (tiny, once per call): fuse Q|K|V into one matmul,
    # fold 1/sqrt(hs) into the Q columns, bf16 MXU weights (f32 accumulation). ----
    wqkv = jnp.concatenate([wq * inv_scale, wk, wv], axis=1).astype(jnp.bfloat16)
    bqkv = jnp.concatenate([bq * inv_scale, bk, bv]).reshape(1, 3 * H).astype(jnp.float32)
    wmix3 = wmix.reshape(num_heads, hs, H).astype(jnp.float32)
    bmix2 = bmix.reshape(1, H).astype(jnp.float32)

    # -------------------- kernel 1: fused QKV projection --------------------
    R = B * S
    x2d = x.reshape(R, D_in)
    TR = _pick_tile(R, (512, 256, 128, 64, 32, 16, 8))
    proj_bytes = (_padded_bytes((TR, D_in), 4) + _padded_bytes((D_in, 3 * H), 2)
                  + _padded_bytes((1, 3 * H), 4) + _padded_bytes((TR, 3 * H), 2))
    qkv = pl.pallas_call(
        _qkv_proj_kernel,
        out_shape=jax.ShapeDtypeStruct((R, 3 * H), jnp.bfloat16),
        grid=(R // TR,),
        in_specs=[
            pl.BlockSpec((TR, D_in), lambda r: (r, 0)),
            pl.BlockSpec((D_in, 3 * H), lambda r: (0, 0)),
            pl.BlockSpec((1, 3 * H), lambda r: (0, 0)),
        ],
        out_specs=pl.BlockSpec((TR, 3 * H), lambda r: (r, 0)),
        compiler_params=pltpu.CompilerParams(
            dimension_semantics=("parallel",),
            vmem_limit_bytes=_vmem_limit(proj_bytes)),
    )(x2d, wqkv, bqkv)

    # Head-major (B, num_heads, S, hs) layout so the attention kernel batches all
    # heads through single MXU contractions (no sub-128-lane head slicing in-kernel).
    # This split/transpose is a small bf16 memory-bound XLA op outside the kernels.
    qkv = qkv.reshape(B, S, 3, num_heads, hs)
    q = jnp.transpose(qkv[:, :, 0], (0, 2, 1, 3))
    k = jnp.transpose(qkv[:, :, 1], (0, 2, 1, 3))
    v = jnp.transpose(qkv[:, :, 2], (0, 2, 1, 3))

    # ------------- kernel 2: flash attention + mix projection ---------------
    TQ = _pick_tile(S, (256, 128))
    TKV = _pick_tile(S, (512, 256, 128))
    nq, nkv = S // TQ, S // TKV

    flash_bytes = (
        _padded_bytes((num_heads, TQ, hs), 2)               # q block
        + 2 * 2 * _padded_bytes((num_heads, TKV, hs), 2)    # k, v (double-buffered)
        + _padded_bytes((num_heads, hs, H), 4)              # wmix
        + _padded_bytes((1, H), 4)                          # bmix
        + _padded_bytes((TQ, H), 4)                         # out block
        + 2 * _padded_bytes((num_heads, TQ, 1), 4)          # m, l scratch
        + _padded_bytes((num_heads, TQ, hs), 4))            # acc scratch

    kernel = functools.partial(_flash_mix_kernel, causal=causal)

    out = pl.pallas_call(
        kernel,
        out_shape=jax.ShapeDtypeStruct((B, S, H), jnp.float32),
        grid=(B, nq, nkv),                                   # KV (reduction) axis last
        in_specs=[
            pl.BlockSpec((pl.Squeezed(), num_heads, TQ, hs),
                         lambda b, qi, ki: (b, 0, qi, 0)),
            # KV tiles stream each step; double-buffered so their DMA overlaps the
            # scores/PV matmuls (raise to pl.Buffered(3) on v5e if DMA is exposed).
            pl.BlockSpec((pl.Squeezed(), num_heads, TKV, hs),
                         lambda b, qi, ki: (b, 0, ki, 0),
                         pipeline_mode=pl.Buffered(2)),
            pl.BlockSpec((pl.Squeezed(), num_heads, TKV, hs),
                         lambda b, qi, ki: (b, 0, ki, 0),
                         pipeline_mode=pl.Buffered(2)),
            pl.BlockSpec((num_heads, hs, H), lambda b, qi, ki: (0, 0, 0)),
            pl.BlockSpec((1, H), lambda b, qi, ki: (0, 0)),
        ],
        out_specs=pl.BlockSpec((pl.Squeezed(), TQ, H), lambda b, qi, ki: (b, qi, 0)),
        scratch_shapes=[
            pltpu.VMEM((num_heads, TQ, 1), jnp.float32),     # running max  m
            pltpu.VMEM((num_heads, TQ, 1), jnp.float32),     # running sum  l
            pltpu.VMEM((num_heads, TQ, hs), jnp.float32),    # output accumulator
        ],
        compiler_params=pltpu.CompilerParams(
            dimension_semantics=("parallel", "parallel", "arbitrary"),
            vmem_limit_bytes=_vmem_limit(flash_bytes)),
    )(q, k, v, wmix3, bmix2)
    return out


# ---------------------------------------------------------------------------
# pure-JAX reference (mirrors the PyTorch forward exactly, f32)
# ---------------------------------------------------------------------------

def _reference(x, params, *, num_heads, causal=False):
    wq, bq, wk, bk, wv, bv, wmix, bmix = params
    B, S, _ = x.shape
    H = wq.shape[1]
    hs = H // num_heads
    scale = hs ** 0.5

    q = x @ wq + bq
    k = x @ wk + bk
    v = x @ wv + bv

    def split_heads(t):  # torch.cat(t.split(hs, dim=-1), dim=0)
        return jnp.concatenate([t[..., h * hs:(h + 1) * hs] for h in range(num_heads)], axis=0)

    q, k, v = split_heads(q), split_heads(k), split_heads(v)
    scores = jnp.einsum('bqd,bkd->bqk', q, k) / scale
    if causal:
        row = jnp.arange(S)[:, None]
        col = jnp.arange(S)[None, :]
        scores = jnp.where(col > row, -jnp.inf, scores)
    probs = jax.nn.softmax(scores, axis=-1)
    att = probs @ v
    att = jnp.concatenate([att[h * B:(h + 1) * B] for h in range(num_heads)], axis=-1)
    return att @ wmix + bmix


def init_params(key, input_size, hidden):
    """Deterministic synthetic init (shapes match nn.Linear params, pre-transposed)."""
    ks = jax.random.split(key, 8)
    s_in = 1.0 / (input_size ** 0.5)
    s_h = 1.0 / (hidden ** 0.5)
    wq = jax.random.uniform(ks[0], (input_size, hidden), jnp.float32, -s_in, s_in)
    bq = jax.random.uniform(ks[1], (hidden,), jnp.float32, -s_in, s_in)
    wk = jax.random.uniform(ks[2], (input_size, hidden), jnp.float32, -s_in, s_in)
    bk = jax.random.uniform(ks[3], (hidden,), jnp.float32, -s_in, s_in)
    wv = jax.random.uniform(ks[4], (input_size, hidden), jnp.float32, -s_in, s_in)
    bv = jax.random.uniform(ks[5], (hidden,), jnp.float32, -s_in, s_in)
    wm = jax.random.uniform(ks[6], (hidden, hidden), jnp.float32, -s_h, s_h)
    bm = jax.random.uniform(ks[7], (hidden,), jnp.float32, -s_h, s_h)
    return (wq, bq, wk, bk, wv, bv, wm, bm)


if __name__ == "__main__":
    batch, seq, input_size, hidden, num_heads = 2, 8, 16, 32, 4

    key = jax.random.PRNGKey(0)
    kx, kp = jax.random.split(key)
    x = jax.random.normal(kx, (batch, seq, input_size), jnp.float32)
    params = init_params(kp, input_size, hidden)

    # Default (non-causal) forward, as in the module defaults.
    fwd = jax.jit(functools.partial(multi_head_self_attention,
                                    num_heads=num_heads, causal=False))
    out = jax.block_until_ready(fwd(x, params))
    ref = _reference(x, params, num_heads=num_heads, causal=False)
    assert out.shape == (batch, seq, hidden)
    # bf16 MXU inputs -> looser tolerance than pure-f32.
    assert jnp.allclose(out, ref, atol=3e-2, rtol=3e-2), "Pallas output mismatch (non-causal)"

    # Also exercise the causal-mask / tile-skip path.
    fwd_c = jax.jit(functools.partial(multi_head_self_attention,
                                      num_heads=num_heads, causal=True))
    out_c = jax.block_until_ready(fwd_c(x, params))
    ref_c = _reference(x, params, num_heads=num_heads, causal=True)
    assert jnp.allclose(out_c, ref_c, atol=3e-2, rtol=3e-2), "Pallas output mismatch (causal)"

    print("KERNEL_OK")
</pallas_src>

<mosaic_0001>
module attributes {stable_mosaic.version = 11 : i64} {
  func.func @_qkv_proj_kernel(%arg0: i32, %arg1: memref<16x16xf32, #tpu.memory_space<vmem>>, %arg2: memref<16x96xbf16, #tpu.memory_space<vmem>>, %arg3: memref<1x96xf32, #tpu.memory_space<vmem>>, %arg4: memref<16x96xbf16, #tpu.memory_space<vmem>>) attributes {dimension_semantics = [#tpu.dimension_semantics<parallel>], iteration_bounds = array<i64: 1>, scalar_prefetch = 0 : i64, scratch_operands = 0 : i64, tpu.core_type = #tpu.core_type<tc>, window_params = [{transform_indices = @transform_0, window_bounds = array<i64: 16, 16>}, {pipeline_mode = #tpu.pipeline_mode<synchronous>, transform_indices = @transform_1, window_bounds = array<i64: 16, 96>}, {pipeline_mode = #tpu.pipeline_mode<synchronous>, transform_indices = @transform_2, window_bounds = array<i64: 1, 96>}, {transform_indices = @transform_3, window_bounds = array<i64: 16, 96>}]} {
    %c0 = arith.constant 0 : index
    %c0_0 = arith.constant 0 : index
    %0 = vector.load %arg1[%c0, %c0_0] : memref<16x16xf32, #tpu.memory_space<vmem>>, vector<16x16xf32>
    %1 = arith.truncf %0 : vector<16x16xf32> to vector<16x16xbf16>
    %c0_1 = arith.constant 0 : index
    %c0_2 = arith.constant 0 : index
    %2 = vector.load %arg2[%c0_1, %c0_2] : memref<16x96xbf16, #tpu.memory_space<vmem>>, vector<16x96xbf16>
    %cst = arith.constant dense<0.000000e+00> : vector<16x96xf32>
    %3 = tpu.matmul %1, %2, %cst {dimension_numbers = #tpu.dot_dimension_numbers<[1], [0], [0], [1], [0, 0, 1, 1], [], []>} : vector<16x16xbf16>, vector<16x96xbf16>, vector<16x96xf32> -> vector<16x96xf32>
    %c0_3 = arith.constant 0 : index
    %c0_4 = arith.constant 0 : index
    %4 = vector.load %arg3[%c0_3, %c0_4] : memref<1x96xf32, #tpu.memory_space<vmem>>, vector<1x96xf32>
    %5 = vector.broadcast %4 : vector<1x96xf32> to vector<16x96xf32>
    %6 = arith.addf %3, %5 : vector<16x96xf32>
    %7 = arith.truncf %6 : vector<16x96xf32> to vector<16x96xbf16>
    %c0_5 = arith.constant 0 : index
    %c0_6 = arith.constant 0 : index
    %8 = vector.load %arg4[%c0_5, %c0_6] : memref<16x96xbf16, #tpu.memory_space<vmem>>, vector<16x96xbf16>
    tpu.vector_store %arg4[%c0_5, %c0_6], %7 {strides = array<i32>} : memref<16x96xbf16, #tpu.memory_space<vmem>>, vector<16x96xbf16>,
    return
  }
  func.func @transform_0(%arg0: i32) -> (i32, i32) {
    %c0_i32 = arith.constant 0 : i32
    %c0_i32_0 = arith.constant 0 : i32
    return %arg0, %c0_i32 : i32, i32
  }
  func.func @transform_1(%arg0: i32) -> (i32, i32) {
    %c0_i32 = arith.constant 0 : i32
    %c0_i32_0 = arith.constant 0 : i32
    %c0_i32_1 = arith.constant 0 : i32
    return %c0_i32, %c0_i32_0 : i32, i32
  }
  func.func @transform_2(%arg0: i32) -> (i32, i32) {
    %c0_i32 = arith.constant 0 : i32
    %c0_i32_0 = arith.constant 0 : i32
    %c0_i32_1 = arith.constant 0 : i32
    return %c0_i32, %c0_i32_0 : i32, i32
  }
  func.func @transform_3(%arg0: i32) -> (i32, i32) {
    %c0_i32 = arith.constant 0 : i32
    %c0_i32_0 = arith.constant 0 : i32
    return %arg0, %c0_i32 : i32, i32
  }
}

module attributes {stable_mosaic.version = 11 : i64} {
  func.func @_flash_mix_kernel(%arg0: i32, %arg1: i32, %arg2: i32, %arg3: memref<1x4x8x8xbf16, #tpu.memory_space<vmem>>, %arg4: memref<1x4x8x8xbf16, #tpu.memory_space<vmem>>, %arg5: memref<1x4x8x8xbf16, #tpu.memory_space<vmem>>, %arg6: memref<4x8x32xf32, #tpu.memory_space<vmem>>, %arg7: memref<1x32xf32, #tpu.memory_space<vmem>>, %arg8: memref<1x8x32xf32, #tpu.memory_space<vmem>>, %arg9: memref<4x8x1xf32, #tpu.memory_space<vmem>>, %arg10: memref<4x8x1xf32, #tpu.memory_space<vmem>>, %arg11: memref<4x8x8xf32, #tpu.memory_space<vmem>>) attributes {dimension_semantics = [#tpu.dimension_semantics<parallel>, #tpu.dimension_semantics<parallel>, #tpu.dimension_semantics<arbitrary>], iteration_bounds = array<i64: 2, 1, 1>, scalar_prefetch = 0 : i64, scratch_operands = 3 : i64, tpu.core_type = #tpu.core_type<tc>, window_params = [{transform_indices = @transform_0, window_bounds = array<i64: 1, 4, 8, 8>}, {pipeline_mode = #tpu.pipeline_mode<double_buffered>, transform_indices = @transform_1, window_bounds = array<i64: 1, 4, 8, 8>}, {pipeline_mode = #tpu.pipeline_mode<double_buffered>, transform_indices = @transform_2, window_bounds = array<i64: 1, 4, 8, 8>}, {pipeline_mode = #tpu.pipeline_mode<synchronous>, transform_indices = @transform_3, window_bounds = array<i64: 4, 8, 32>}, {pipeline_mode = #tpu.pipeline_mode<synchronous>, transform_indices = @transform_4, window_bounds = array<i64: 1, 32>}, {transform_indices = @transform_5, window_bounds = array<i64: 1, 8, 32>}]} {
    %c0_i32 = arith.constant 0 : i32
    %0 = arith.cmpi eq, %arg2, %c0_i32 : i32
    %1 = arith.extui %0 : i1 to i32
    %c0_i32_0 = arith.constant 0 : i32
    %2 = arith.cmpi ne, %1, %c0_i32_0 : i32
    scf.if %2 {
      %cst_35 = arith.constant 0xFF800000 : f32
      %36 = vector.broadcast %cst_35 : f32 to vector<4x8x1xf32>
      %c0_36 = arith.constant 0 : index
      %c0_37 = arith.constant 0 : index
      %c0_38 = arith.constant 0 : index
      %37 = vector.load %arg9[%c0_36, %c0_37, %c0_38] : memref<4x8x1xf32, #tpu.memory_space<vmem>>, vector<4x8x1xf32>
      tpu.vector_store %arg9[%c0_36, %c0_37, %c0_38], %36 {strides = array<i32>} : memref<4x8x1xf32, #tpu.memory_space<vmem>>, vector<4x8x1xf32>,
      %cst_39 = arith.constant 0.000000e+00 : f32
      %38 = vector.broadcast %cst_39 : f32 to vector<4x8x1xf32>
      %c0_40 = arith.constant 0 : index
      %c0_41 = arith.constant 0 : index
      %c0_42 = arith.constant 0 : index
      %39 = vector.load %arg10[%c0_40, %c0_41, %c0_42] : memref<4x8x1xf32, #tpu.memory_space<vmem>>, vector<4x8x1xf32>
      tpu.vector_store %arg10[%c0_40, %c0_41, %c0_42], %38 {strides = array<i32>} : memref<4x8x1xf32, #tpu.memory_space<vmem>>, vector<4x8x1xf32>,
      %cst_43 = arith.constant 0.000000e+00 : f32
      %40 = vector.broadcast %cst_43 : f32 to vector<4x8x8xf32>
      %c0_44 = arith.constant 0 : index
      %c0_45 = arith.constant 0 : index
      %c0_46 = arith.constant 0 : index
      %41 = vector.load %arg11[%c0_44, %c0_45, %c0_46] : memref<4x8x8xf32, #tpu.memory_space<vmem>>, vector<4x8x8xf32>
      tpu.vector_store %arg11[%c0_44, %c0_45, %c0_46], %40 {strides = array<i32>} : memref<4x8x8xf32, #tpu.memory_space<vmem>>, vector<4x8x8xf32>,
    } else {
    }
    %c0 = arith.constant 0 : index
    %c0_1 = arith.constant 0 : index
    %c0_2 = arith.constant 0 : index
    %c0_3 = arith.constant 0 : index
    %3 = vector.load %arg3[%c0, %c0_1, %c0_2, %c0_3] : memref<1x4x8x8xbf16, #tpu.memory_space<vmem>>, vector<1x4x8x8xbf16>
    %4 = vector.shape_cast %3 : vector<1x4x8x8xbf16> to vector<4x8x8xbf16>
    %c0_4 = arith.constant 0 : index
    %c0_5 = arith.constant 0 : index
    %c0_6 = arith.constant 0 : index
    %c0_7 = arith.constant 0 : index
    %5 = vector.load %arg4[%c0_4, %c0_5, %c0_6, %c0_7] : memref<1x4x8x8xbf16, #tpu.memory_space<vmem>>, vector<1x4x8x8xbf16>
    %6 = vector.shape_cast %5 : vector<1x4x8x8xbf16> to vector<4x8x8xbf16>
    %c0_8 = arith.constant 0 : index
    %c0_9 = arith.constant 0 : index
    %c0_10 = arith.constant 0 : index
    %c0_11 = arith.constant 0 : index
    %7 = vector.load %arg5[%c0_8, %c0_9, %c0_10, %c0_11] : memref<1x4x8x8xbf16, #tpu.memory_space<vmem>>, vector<1x4x8x8xbf16>
    %8 = vector.shape_cast %7 : vector<1x4x8x8xbf16> to vector<4x8x8xbf16>
    "tpu.trace_start"() <{level = 10 : i32, message = "hqd,hkd->hqk"}> : () -> ()
    %cst = arith.constant dense<0.000000e+00> : vector<4x8x8xf32>
    %9 = tpu.matmul %4, %6, %cst {dimension_numbers = #tpu.dot_dimension_numbers<[2], [2], [1], [1], [0, 0, 0, 1, 1, 1], [0], [0]>} : vector<4x8x8xbf16>, vector<4x8x8xbf16>, vector<4x8x8xf32> -> vector<4x8x8xf32>
    "tpu.trace_stop"() : () -> ()
    %c0_12 = arith.constant 0 : index
    %c0_13 = arith.constant 0 : index
    %c0_14 = arith.constant 0 : index
    %10 = vector.load %arg9[%c0_12, %c0_13, %c0_14] : memref<4x8x1xf32, #tpu.memory_space<vmem>>, vector<4x8x1xf32>
    %cst_15 = arith.constant dense<0xFF800000> : vector<4x8xf32>
    %11 = vector.multi_reduction <maximumf>, %9, %cst_15 [2] : vector<4x8x8xf32> to vector<4x8xf32>
    %12 = vector.shape_cast %11 : vector<4x8xf32> to vector<4x8x1xf32>
    %13 = arith.maximumf %10, %12 : vector<4x8x1xf32>
    %14 = arith.subf %10, %13 : vector<4x8x1xf32>
    %15 = math.exp %14 : vector<4x8x1xf32>
    %16 = vector.broadcast %13 : vector<4x8x1xf32> to vector<4x8x8xf32>
    %17 = arith.subf %9, %16 : vector<4x8x8xf32>
    %18 = math.exp %17 : vector<4x8x8xf32>
    %c0_16 = arith.constant 0 : index
    %c0_17 = arith.constant 0 : index
    %c0_18 = arith.constant 0 : index
    %19 = vector.load %arg10[%c0_16, %c0_17, %c0_18] : memref<4x8x1xf32, #tpu.memory_space<vmem>>, vector<4x8x1xf32>
    %20 = arith.mulf %15, %19 : vector<4x8x1xf32>
    %cst_19 = arith.constant dense<0.000000e+00> : vector<4x8xf32>
    %21 = vector.multi_reduction <add>, %18, %cst_19 [2] : vector<4x8x8xf32> to vector<4x8xf32>
    %22 = vector.shape_cast %21 : vector<4x8xf32> to vector<4x8x1xf32>
    %23 = arith.addf %20, %22 : vector<4x8x1xf32>
    %c0_20 = arith.constant 0 : index
    %c0_21 = arith.constant 0 : index
    %c0_22 = arith.constant 0 : index
    %24 = vector.load %arg10[%c0_20, %c0_21, %c0_22] : memref<4x8x1xf32, #tpu.memory_space<vmem>>, vector<4x8x1xf32>
    tpu.vector_store %arg10[%c0_20, %c0_21, %c0_22], %23 {strides = array<i32>} : memref<4x8x1xf32, #tpu.memory_space<vmem>>, vector<4x8x1xf32>,
    %c0_23 = arith.constant 0 : index
    %c0_24 = arith.constant 0 : index
    %c0_25 = arith.constant 0 : index
    %25 = vector.load %arg11[%c0_23, %c0_24, %c0_25] : memref<4x8x8xf32, #tpu.memory_space<vmem>>, vector<4x8x8xf32>
    %26 = vector.broadcast %15 : vector<4x8x1xf32> to vector<4x8x8xf32>
    %27 = arith.mulf %26, %25 : vector<4x8x8xf32>
    %28 = arith.truncf %18 : vector<4x8x8xf32> to vector<4x8x8xbf16>
    "tpu.trace_start"() <{level = 10 : i32, message = "hqk,hkd->hqd"}> : () -> ()
    %cst_26 = arith.constant dense<0.000000e+00> : vector<4x8x8xf32>
    %29 = tpu.matmul %28, %8, %cst_26 {dimension_numbers = #tpu.dot_dimension_numbers<[2], [1], [1], [2], [0, 0, 0, 1, 1, 2], [0], [0]>} : vector<4x8x8xbf16>, vector<4x8x8xbf16>, vector<4x8x8xf32> -> vector<4x8x8xf32>
    "tpu.trace_stop"() : () -> ()
    %30 = arith.addf %27, %29 : vector<4x8x8xf32>
    %c0_27 = arith.constant 0 : index
    %c0_28 = arith.constant 0 : index
    %c0_29 = arith.constant 0 : index
    %31 = vector.load %arg11[%c0_27, %c0_28, %c0_29] : memref<4x8x8xf32, #tpu.memory_space<vmem>>, vector<4x8x8xf32>
    tpu.vector_store %arg11[%c0_27, %c0_28, %c0_29], %30 {strides = array<i32>} : memref<4x8x8xf32, #tpu.memory_space<vmem>>, vector<4x8x8xf32>,
    %c0_30 = arith.constant 0 : index
    %c0_31 = arith.constant 0 : index
    %c0_32 = arith.constant 0 : index
    %32 = vector.load %arg9[%c0_30, %c0_31, %c0_32] : memref<4x8x1xf32, #tpu.memory_space<vmem>>, vector<4x8x1xf32>
    tpu.vector_store %arg9[%c0_30, %c0_31, %c0_32], %13 {strides = array<i32>} : memref<4x8x1xf32, #tpu.memory_space<vmem>>, vector<4x8x1xf32>,
    %c0_i32_33 = arith.constant 0 : i32
    %33 = arith.cmpi eq, %arg2, %c0_i32_33 : i32
    %34 = arith.extui %33 : i1 to i32
    %c0_i32_34 = arith.constant 0 : i32
    %35 = arith.cmpi ne, %34, %c0_i32_34 : i32
    scf.if %35 {
      %c0_35 = arith.constant 0 : index
      %c0_36 = arith.constant 0 : index
      %c0_37 = arith.constant 0 : index
      %36 = vector.load %arg11[%c0_35, %c0_36, %c0_37] : memref<4x8x8xf32, #tpu.memory_space<vmem>>, vector<4x8x8xf32>
      %c0_38 = arith.constant 0 : index
      %c0_39 = arith.constant 0 : index
      %c0_40 = arith.constant 0 : index
      %37 = vector.load %arg10[%c0_38, %c0_39, %c0_40] : memref<4x8x1xf32, #tpu.memory_space<vmem>>, vector<4x8x1xf32>
      %38 = tpu.reciprocal %37 {approx = true} : vector<4x8x1xf32> -> vector<4x8x1xf32>
      %39 = vector.broadcast %38 : vector<4x8x1xf32> to vector<4x8x8xf32>
      %40 = arith.mulf %36, %39 : vector<4x8x8xf32>
      %41 = vector.extract_strided_slice %40 {offsets = [0, 0, 0], sizes = [1, 8, 8], strides = [1, 1, 1]} : vector<4x8x8xf32> to vector<1x8x8xf32>
      %42 = vector.shape_cast %41 : vector<1x8x8xf32> to vector<8x8xf32>
      %c0_41 = arith.constant 0 : index
      %c0_42 = arith.constant 0 : index
      %c0_43 = arith.constant 0 : index
      %43 = vector.load %arg6[%c0_41, %c0_42, %c0_43] : memref<4x8x32xf32, #tpu.memory_space<vmem>>, vector<1x8x32xf32>
      %44 = vector.shape_cast %43 : vector<1x8x32xf32> to vector<8x32xf32>
      %cst_44 = arith.constant dense<0.000000e+00> : vector<8x32xf32>
      %45 = tpu.matmul %42, %44, %cst_44 {dimension_numbers = #tpu.dot_dimension_numbers<[1], [0], [0], [1], [0, 0, 1, 1], [], []>} : vector<8x8xf32>, vector<8x32xf32>, vector<8x32xf32> -> vector<8x32xf32>
      %46 = vector.extract_strided_slice %40 {offsets = [1, 0, 0], sizes = [1, 8, 8], strides = [1, 1, 1]} : vector<4x8x8xf32> to vector<1x8x8xf32>
      %47 = vector.shape_cast %46 : vector<1x8x8xf32> to vector<8x8xf32>
      %c1 = arith.constant 1 : index
      %c0_45 = arith.constant 0 : index
      %c0_46 = arith.constant 0 : index
      %48 = vector.load %arg6[%c1, %c0_45, %c0_46] : memref<4x8x32xf32, #tpu.memory_space<vmem>>, vector<1x8x32xf32>
      %49 = vector.shape_cast %48 : vector<1x8x32xf32> to vector<8x32xf32>
      %cst_47 = arith.constant dense<0.000000e+00> : vector<8x32xf32>
      %50 = tpu.matmul %47, %49, %cst_47 {dimension_numbers = #tpu.dot_dimension_numbers<[1], [0], [0], [1], [0, 0, 1, 1], [], []>} : vector<8x8xf32>, vector<8x32xf32>, vector<8x32xf32> -> vector<8x32xf32>
      %51 = arith.addf %45, %50 : vector<8x32xf32>
      %52 = vector.extract_strided_slice %40 {offsets = [2, 0, 0], sizes = [1, 8, 8], strides = [1, 1, 1]} : vector<4x8x8xf32> to vector<1x8x8xf32>
      %53 = vector.shape_cast %52 : vector<1x8x8xf32> to vector<8x8xf32>
      %c2 = arith.constant 2 : index
      %c0_48 = arith.constant 0 : index
      %c0_49 = arith.constant 0 : index
      %54 = vector.load %arg6[%c2, %c0_48, %c0_49] : memref<4x8x32xf32, #tpu.memory_space<vmem>>, vector<1x8x32xf32>
      %55 = vector.shape_cast %54 : vector<1x8x32xf32> to vector<8x32xf32>
      %cst_50 = arith.constant dense<0.000000e+00> : vector<8x32xf32>
      %56 = tpu.matmul %53, %55, %cst_50 {dimension_numbers = #tpu.dot_dimension_numbers<[1], [0], [0], [1], [0, 0, 1, 1], [], []>} : vector<8x8xf32>, vector<8x32xf32>, vector<8x32xf32> -> vector<8x32xf32>
      %57 = arith.addf %51, %56 : vector<8x32xf32>
      %58 = vector.extract_strided_slice %40 {offsets = [3, 0, 0], sizes = [1, 8, 8], strides = [1, 1, 1]} : vector<4x8x8xf32> to vector<1x8x8xf32>
      %59 = vector.shape_cast %58 : vector<1x8x8xf32> to vector<8x8xf32>
      %c3 = arith.constant 3 : index
      %c0_51 = arith.constant 0 : index
      %c0_52 = arith.constant 0 : index
      %60 = vector.load %arg6[%c3, %c0_51, %c0_52] : memref<4x8x32xf32, #tpu.memory_space<vmem>>, vector<1x8x32xf32>
      %61 = vector.shape_cast %60 : vector<1x8x32xf32> to vector<8x32xf32>
      %cst_53 = arith.constant dense<0.000000e+00> : vector<8x32xf32>
      %62 = tpu.matmul %59, %61, %cst_53 {dimension_numbers = #tpu.dot_dimension_numbers<[1], [0], [0], [1], [0, 0, 1, 1], [], []>} : vector<8x8xf32>, vector<8x32xf32>, vector<8x32xf32> -> vector<8x32xf32>
      %63 = arith.addf %57, %62 : vector<8x32xf32>
      %c0_54 = arith.constant 0 : index
      %c0_55 = arith.constant 0 : index
      %64 = vector.load %arg7[%c0_54, %c0_55] : memref<1x32xf32, #tpu.memory_space<vmem>>, vector<1x32xf32>
      %65 = vector.broadcast %64 : vector<1x32xf32> to vector<8x32xf32>
      %66 = arith.addf %63, %65 : vector<8x32xf32>
      %c0_56 = arith.constant 0 : index
      %c0_57 = arith.constant 0 : index
      %c0_58 = arith.constant 0 : index
      %67 = vector.load %arg8[%c0_56, %c0_57, %c0_58] : memref<1x8x32xf32, #tpu.memory_space<vmem>>, vector<1x8x32xf32>
      %68 = vector.shape_cast %67 : vector<1x8x32xf32> to vector<8x32xf32>
      %69 = vector.shape_cast %66 : vector<8x32xf32> to vector<1x8x32xf32>
      tpu.vector_store %arg8[%c0_56, %c0_57, %c0_58], %69 {strides = array<i32>} : memref<1x8x32xf32, #tpu.memory_space<vmem>>, vector<1x8x32xf32>,
    } else {
    }
    return
  }
  func.func @transform_0(%arg0: i32, %arg1: i32, %arg2: i32) -> (i32, i32, i32, i32) {
    %c0_i32 = arith.constant 0 : i32
    %c0_i32_0 = arith.constant 0 : i32
    %c0_i32_1 = arith.constant 0 : i32
    return %arg0, %c0_i32, %arg1, %c0_i32_0 : i32, i32, i32, i32
  }
  func.func @transform_1(%arg0: i32, %arg1: i32, %arg2: i32) -> (i32, i32, i32, i32) {
    %c0_i32 = arith.constant 0 : i32
    %c0_i32_0 = arith.constant 0 : i32
    %c0_i32_1 = arith.constant 0 : i32
    return %arg0, %c0_i32, %arg2, %c0_i32_0 : i32, i32, i32, i32
  }
  func.func @transform_2(%arg0: i32, %arg1: i32, %arg2: i32) -> (i32, i32, i32, i32) {
    %c0_i32 = arith.constant 0 : i32
    %c0_i32_0 = arith.constant 0 : i32
    %c0_i32_1 = arith.constant 0 : i32
    return %arg0, %c0_i32, %arg2, %c0_i32_0 : i32, i32, i32, i32
  }
  func.func @transform_3(%arg0: i32, %arg1: i32, %arg2: i32) -> (i32, i32, i32) {
    %c0_i32 = arith.constant 0 : i32
    %c0_i32_0 = arith.constant 0 : i32
    %c0_i32_1 = arith.constant 0 : i32
    %c0_i32_2 = arith.constant 0 : i32
    return %c0_i32, %c0_i32_0, %c0_i32_1 : i32, i32, i32
  }
  func.func @transform_4(%arg0: i32, %arg1: i32, %arg2: i32) -> (i32, i32) {
    %c0_i32 = arith.constant 0 : i32
    %c0_i32_0 = arith.constant 0 : i32
    %c0_i32_1 = arith.constant 0 : i32
    return %c0_i32, %c0_i32_0 : i32, i32
  }
  func.func @transform_5(%arg0: i32, %arg1: i32, %arg2: i32) -> (i32, i32, i32) {
    %c0_i32 = arith.constant 0 : i32
    %c0_i32_0 = arith.constant 0 : i32
    return %arg0, %arg1, %c0_i32 : i32, i32, i32
  }
}

</mosaic_0001>

<bundles_post_ra>
// kernel: multi_head_self_attention.2
= control target key start
LH: loop header
LB: loop body
LE: loop exit
PB: predicated region body
PF: predicated region fallthrough
CT: control target
= control target key end

     0   :  { %v111_v0 = vmov 0.0   ;;  %vm112_vm0 = vmmov 0   ;;  %vm33_vm1 = vcmask 130048   ;;  %vm86_vm2 = vcmask 781312   ;;  %s151_s1 = inlined_call_operand.vmem [shape: bf16[16,96], index: 1, kind: input, shape index: {}]   ;;  %s152_s0 = inlined_call_operand.vmem [shape: f32[16,16], index: 0, kind: input, shape index: {}]   ;;  %s153_s2 = inlined_call_operand.vmem [shape: f32[1,96], index: 2, kind: input, shape index: {}]   ;;  %s154_s3 = inlined_call_operand.vmem [shape: bf16[16,96], index: 3, kind: output, shape index: {}]  }
   0x1   :  { %102 = vmatprep.subr.bf16.mxu0 %v111_v0  ;;  %v110_v1 = vld [vmem:[%s151_s1] sm:$0xff]   ;;  %104 = vmatprep.mubr.msk.bf16.mxu0 %vm112_vm0, %v111_v0  ;;  %v16_v3 = vld [vmem:[%s152_s0 + $0x8] sm:$0xff] }
   0x2   :  { %v15_v2 = vld [vmem:[%s152_s0] sm:$0xff]  ;;  %103 = vmatpush3.bf16.msra.mxu0 %v110_v1 }
   0x3   :  { %v17_v4 = vpack.c.bf16 %v16_v3, %v15_v2  ;;  %v93_v5 = vld [vmem:[%s153_s2] ss:$0 sm:$0xff] }
   0x5   :  { %105 = vmatmul.mubr.msk.bf16.vlgmr.msra.gmra.mrb[0].mxu0 %vm33_vm1, %v17_v4 }
  0xd8   :  { %v71_v6 = vpop.f32.mrb[0].mxu0 }
  0xd9   :  { %v72_v7 = vadd.f32 %v93_v5, %v71_v6  ;;  %v106_v8 = vpop.f32.mrb[1].mxu0 }
  0xda   :  { %v74_v9 = vpop.f32.mrb[2].mxu0 }
  0xdb   :  { %v98_v10 = vpack.c.bf16 %v72_v7, %v72_v7  ;;  %v75_v11 = vadd.f32 %v93_v5, %v74_v9  ;;  %v107_v12 = vpop.f32.mrb[3].mxu0 }
  0xdd   :  { %87 = vst.msk [vmem:[%s154_s3] sm:$0xf] %vm86_vm2, %v98_v10  ;;  %v99_v13 = vpack.c.bf16 %v75_v11, %v75_v11 }
  0xdf   :  { %88 = vst.msk [vmem:[%s154_s3 + $0x4] sm:$0xf] %vm86_vm2, %v99_v13 }

// kernel: multi_head_self_attention.3
= control target key start
LH: loop header
LB: loop body
LE: loop exit
PB: predicated region body
PF: predicated region fallthrough
CT: control target
= control target key end

     0   :  { %10 = vsyncpa [#allocation6], 0  ;;  %s1954_s0 = inlined_call_operand.vmem [shape: bf16[2,4,8,8], index: 0, kind: input, shape index: {}]   ;;  %s1955_s1 = inlined_call_operand.vmem [shape: bf16[2,4,8,8], index: 1, kind: input, shape index: {}]   ;;  %s1956_s2 = inlined_call_operand.vmem [shape: bf16[2,4,8,8], index: 2, kind: input, shape index: {}]   ;;  %s1957_s3 = inlined_call_operand.vmem [shape: f32[4,8,32], index: 3, kind: input, shape index: {}]   ;;  %s1958_s4 = inlined_call_operand.vmem [shape: f32[1,32], index: 4, kind: input, shape index: {}]   ;;  %s1959_s5 = inlined_call_operand.hbm [shape: f32[2,8,32], index: 5, kind: output, shape index: {}]  }
   0x1   :  { %12 = vsyncpa [#allocation6 + $0x1], 0  ;;  %s1660_s18 = smov 0   ;;  %s1662_s19 = smov 0  }
   0x2   :  { %s1664_s20 = smov 0   ;;  %s1666_s21 = smov 0  }
   0x3   :  { %s1668_s22 = smov 0   ;;  %s1670_s23 = smov 0  }
   0x4 LB: > { %s1333_s24 = sadd.s32 4294967295, %s1623_s23   ;;  %s1334_s25 = sadd.s32 4294967294, %s1623_s23   ;;  %s1623_s23 = sphi %s1670_s23, %s18_s23   ;;  %s1619_s22 = sphi %s1668_s22, %s1966_s22   ;;  %s1615_s21 = sphi %s1666_s21, %s1965_s21   ;;  %s1611_s20 = sphi %s1664_s20, %s1964_s20   ;;  %s1607_s19 = sphi %s1662_s19, %s1963_s19   ;;  %s1603_s18 = sphi %s1660_s18, %s1962_s18  }
   0x5   : > { %s37_s26 = sadd.s32 1, %s1619_s22  ;;  %s172_s27 = sadd.s32 1, %s1611_s20 }
   0x6   : > { %p39_p0 = scmp.ge.s32.totalorder %s37_s26, 2  ;;  %p182_p1 = scmp.ne.s32.totalorder %s1611_s20, %s1607_s19 }
   0x7   : > { %p183_p2 = scmp.eq.s32.totalorder %s1333_s24, 1  ;;  %p188_p3 = scmp.ne.s32.totalorder %s1607_s19, %s1603_s18 }
   0x8   : > { %s1968_s26 = smov (%p39_p0, %s37_s26), 0  ;;  %p189_p5 = scmp.eq.s32.totalorder %s1334_s25, 1 }
   0x9   : > { %p1700_p4 = por %p183_p2, %p182_p1  ;;  %s167_s29 = ssub.s32 %s1619_s22, %s1968_s26 }
   0xa   : > { %p1337_p6 = scmp.ge.s32.totalorder %s1623_s23, 1  ;;  %p170_p7 = scmp.eq.s32.totalorder %s167_s29, 0 }
   0xb   : > { %p1707_p8 = por %p189_p5, %p188_p3  ;;  %p246_p9 = scmp.lt.s32.totalorder %s1623_s23, 3 }
   0xc   : > { %s1713_s6 = scalar_select %p170_p7, %s1611_s20, %s172_s27  }
   0xd   : > { %p247_p10 = pnand %p1337_p6, %p246_p9 }
   0xe   : > { %p293_p11 = scmp.lt.s32.totalorder (!%p247_p10), %s1615_s21, 1  ;;  %vm331_vm0 = vcmask (!%p247_p10), 64512   ;;  %v1625_v0 = vmov (!%p247_p10), 0.0   ;;  %vm1626_vm1 = vmmov (!%p247_p10), 0   ;;  %vm322_vm2 = vcmask (!%p247_p10), 7168   ;;  %s1362_s15 = sshll.u32 (!%p247_p10), %s1615_s21, 7 }
   0xf   : > { %250 = sbr.rel (%p247_p10) target bundleno = 1071 (0x42f), region = 40  ;;  %1392 = vmatprep.subr.bf16.mxu0 (!%p247_p10), %v1625_v0  ;;  %332 = vst.msk [vmem:[#allocation4] sm:$0xff] (!%p247_p10), %vm331_vm0, %v1625_v0  ;;  %333 = vst.msk [vmem:[#allocation4 + $0x8] sm:$0xff] (!%p247_p10), %vm331_vm0, %v1625_v0  ;;  %1398 = vmatprep.subr.bf16.mxu1 (!%p247_p10), %v1625_v0  ;;  %v1627_v13 = vmov (!%p247_p10), -inf   ;;  %v1628_v34 = vmov (!%p247_p10), 0   ;;  %vm661_vm3 = vcmask (!%p247_p10), 1043456   ;;  %s1907_s27 = scalar_lea.hbm (!%p247_p10), %s1959_s5, %s1362_s15 }
  0x10   : > { %334 = vst.msk [vmem:[#allocation4 + $0x10] sm:$0xff] (!%p247_p10), %vm331_vm0, %v1625_v0  ;;  %335 = vst.msk [vmem:[#allocation4 + $0x18] sm:$0xff] (!%p247_p10), %vm331_vm0, %v1625_v0  ;;  %1394 = vmatprep.mubr.msk.bf16.mxu0 (!%p247_p10), %vm1626_vm1, %v1625_v0  ;;  %1400 = vmatprep.mubr.msk.bf16.mxu1 (!%p247_p10), %vm1626_vm1, %v1625_v0  ;;  %vm1203_vm4 = vcmask (!%p247_p10), 261120  }
  0x11   : > { %323 = vst.msk [vmem:[#allocation2] sm:$0xff] (!%p247_p10), %vm322_vm2, %v1627_v13  ;;  %324 = vst.msk [vmem:[#allocation2 + $0x8] sm:$0xff] (!%p247_p10), %vm322_vm2, %v1627_v13  ;;  %1519 = vset.pattern.permute.xlu0 (!%p247_p10), %v1628_v34  ;;  %1520 = vset.pattern.permute.xlu1 (!%p247_p10), %v1628_v34 }
  0x12   : > { %325 = vst.msk [vmem:[#allocation2 + $0x10] sm:$0xff] (!%p247_p10), %vm322_vm2, %v1627_v13  ;;  %326 = vst.msk [vmem:[#allocation2 + $0x18] sm:$0xff] (!%p247_p10), %vm322_vm2, %v1627_v13 }
  0x13   : > { %327 = vst.msk [vmem:[#allocation3] sm:$0xff] (!%p247_p10), %vm322_vm2, %v1625_v0  ;;  %328 = vst.msk [vmem:[#allocation3 + $0x8] sm:$0xff] (!%p247_p10), %vm322_vm2, %v1625_v0 }
  0x14   : > { %329 = vst.msk [vmem:[#allocation3 + $0x10] sm:$0xff] (!%p247_p10), %vm322_vm2, %v1625_v0  ;;  %330 = vst.msk [vmem:[#allocation3 + $0x18] sm:$0xff] (!%p247_p10), %vm322_vm2, %v1625_v0 }
  0x16   : > { %s294_s7 = scalar_select %p293_p11, %s1615_s21, 1 }
  0x17   : > { %s1629_s21 = smov [#allocation5]  }
  0x18   : > { %s1731_s8 = sshll.u32 %s294_s7, 4  ;;  %v1789_v35 = vld [vmem:[#allocation2] sm:$0xff]  ;;  %v1794_v38 = vld [vmem:[#allocation2 + $0x8] sm:$0xff] }
  0x19   : > { %s308_s11 = scalar_lea.vmem %s1955_s1, %s1731_s8  ;;  %s300_s14 = scalar_lea.vmem %s1954_s0, %s1731_s8  ;;  %v1804_v42 = vld [vmem:[#allocation2 + $0x10] sm:$0xff]  ;;  %v1814_v46 = vld [vmem:[#allocation2 + $0x18] sm:$0xff] }
  0x1a   : > { %v340_v1 = vld [vmem:[%s308_s11] sm:$0xf]  ;;  %v341_v2 = vld [vmem:[%s308_s11 + $0x4] sm:$0xf]  ;;  %v342_v5 = vld [vmem:[%s308_s11 + $0x8] sm:$0xf]  ;;  %s316_s17 = scalar_lea.vmem %s1956_s2, %s1731_s8 }
  0x1b   : > { %v353_v3 = vsel %vm331_vm0, %v340_v1, 0  ;;  %v399_v4 = vsel %vm331_vm0, %v341_v2, 0  ;;  %v343_v6 = vld [vmem:[%s308_s11 + $0xc] sm:$0xf]  ;;  %v336_v7 = vld [vmem:[%s300_s14] sm:$0xf] }
  0x1c   : > { %1393 = vmatpush3.bf16.xpose.msra.mxu0 %v353_v3  ;;  %1399 = vmatpush3.bf16.xpose.msra.mxu1 %v399_v4  ;;  %v337_v8 = vld [vmem:[%s300_s14 + $0x4] sm:$0xf]  ;;  %v445_v9 = vsel %vm331_vm0, %v342_v5, 0  ;;  %v491_v10 = vsel %vm331_vm0, %v343_v6, 0  ;;  %v338_v11 = vld [vmem:[%s300_s14 + $0x8] sm:$0xf] }
  0x1d   : > { %1404 = vmatprep.subr.bf16.mxu0 %v1625_v0  ;;  %1410 = vmatprep.subr.bf16.mxu1 %v1625_v0  ;;  %v339_v12 = vld [vmem:[%s300_s14 + $0xc] sm:$0xf]  ;;  %v344_v51 = vld [vmem:[%s316_s17] sm:$0xf]  ;;  %v345_v53 = vld [vmem:[%s316_s17 + $0x4] sm:$0xf] }
  0x1e   : > { %v663_v52 = vsel %vm661_vm3, %v344_v51, 0  ;;  %v709_v54 = vsel %vm661_vm3, %v345_v53, 0  ;;  %v346_v55 = vld [vmem:[%s316_s17 + $0x8] sm:$0xf]  ;;  %v347_v57 = vld [vmem:[%s316_s17 + $0xc] sm:$0xf] }
  0x1f   : > { %v755_v56 = vsel %vm661_vm3, %v346_v55, 0  ;;  %v801_v58 = vsel %vm661_vm3, %v347_v57, 0  ;;  %s290_s11 = sand.u32 1, %s1607_s19   ;;  %s1549_s8 = sshll.u32 %s1629_s21, 4  ;;  %s1550_s8 = int_to_ptr.vmem [resolvable:$false] %s1549_s8 }
  0x20   : > { %s1338_s12 = sshll.u32 %s290_s11, 3  ;;  %s1206_s29 = scalar_lea.sflag [#allocation6], %s290_s11 }
  0x21   : > { %s292_s16 = scalar_lea.vmem [#allocation5], %s1338_s12  ;;  %s1551_s9 = scalar_lea.vmem %s1550_s8, 256 }
  0x22   : > { %s1220_s17 = sshll.u32 %s292_s16, 4  ;;  %s1909_s17 = int_to_ptr.vmem [resolvable:$true] %s1220_s17 }
  0x23   : > { %1395 = vmatmul.mubr.msk.bf16.vlgmr.msra.gmra.mrb[0].mxu0 %vm331_vm0, %v336_v7  ;;  %1401 = vmatmul.mubr.msk.bf16.vlgmr.msra.gmra.mrb[0].mxu1 %vm331_vm0, %v337_v8  ;;  %s1545_s7 = scalar_lea.vmem %s1909_s17, 128  ;;  %p1552_p1 = scmp.lt.s32.totalorder %s1909_s17, %s1550_s8 }
  0x24   : > { %1405 = vmatpush3.bf16.xpose.msra.mxu0 %v445_v9  ;;  %1411 = vmatpush3.bf16.xpose.msra.mxu1 %v491_v10  ;;  %p1546_p12 = scmp.ne.s32.totalorder %s1909_s17, %s1545_s7  ;;  %p1553_p2 = scmp.lt.s32.totalorder %s1551_s9, %s1545_s7 }
  0x25   : > { %1406 = vmatprep.mubr.msk.bf16.mxu0 %vm1626_vm1, %v1625_v0  ;;  %1412 = vmatprep.mubr.msk.bf16.mxu1 %vm1626_vm1, %v1625_v0 }
  0x26   : > { %1416 = vmatprep.subr.bf16.mxu0 %v1625_v0  ;;  %1422 = vmatprep.subr.bf16.mxu1 %v1625_v0  ;;  %p1547_p13 = pnand %p1546_p12, %p1700_p4  ;;  %p1554_p3 = por %p1553_p2, %p1552_p1 }
  0x28   : > { %p1548_p0 = pneg %p1547_p13 }
  0x2a   : > { %p1555_p5 = pnand %p1554_p3, %p1548_p0 }
  0x2b   : > { %1407 = vmatmul.mubr.msk.bf16.vlgmr.msra.gmra.mrb[4].mxu0 %vm331_vm0, %v338_v11  ;;  %1413 = vmatmul.mubr.msk.bf16.vlgmr.msra.gmra.mrb[4].mxu1 %vm331_vm0, %v339_v12 }
  0x2c   : > { %1418 = vmatprep.mubr.msk.bf16.mxu0 %vm1626_vm1, %v1625_v0  ;;  %1424 = vmatprep.mubr.msk.bf16.mxu1 %vm1626_vm1, %v1625_v0 }
  0x2d   : > { %1417 = vmatpush3.bf16.msra.mxu0 %v663_v52  ;;  %1423 = vmatpush3.bf16.msra.mxu1 %v709_v54  ;;  %v626_v54 = vld [vmem:[#allocation4] sm:$0xff] }
  0x2e   : > { %1428 = vmatprep.subr.bf16.mxu0 %v1625_v0  ;;  %1434 = vmatprep.subr.bf16.mxu1 %v1625_v0 }
  0xf6   : > { %v1773_v14 = vpop.f32.mrb[0].mxu0  ;;  %v1775_v15 = vpop.f32.mrb[0].mxu1 }
  0xf7   : > { %v1396_v16 = vpop.f32.mrb[1].mxu0  ;;  %v537_v17 = vsel %vm331_vm0, %v1773_v14, -inf  ;;  %v1402_v18 = vpop.f32.mrb[1].mxu1  ;;  %v540_v23 = vsel %vm331_vm0, %v1775_v15, -inf }
  0xf8   : > { %538 = vmax.xlane.f32.xlu0 %v537_v17  ;;  %v392_v19 = vpop.f32.mrb[2].mxu0  ;;  %v438_v20 = vpop.f32.mrb[2].mxu1 }
  0xf9   : > { %v1397_v21 = vpop.f32.mrb[3].mxu0  ;;  %v1403_v22 = vpop.f32.mrb[3].mxu1 }
  0xfc   : > { %541 = vmax.xlane.f32.xlu0 %v540_v23 }
  0xfe   : > { %v1781_v24 = vpop.f32.mrb[4].mxu0  ;;  %v1783_v25 = vpop.f32.mrb[4].mxu1 }
  0xff   : > { %v1408_v26 = vpop.f32.mrb[5].mxu0  ;;  %v543_v27 = vsel %vm331_vm0, %v1781_v24, -inf  ;;  %v1414_v28 = vpop.f32.mrb[5].mxu1  ;;  %v546_v33 = vsel %vm331_vm0, %v1783_v25, -inf }
 0x100   : > { %544 = vmax.xlane.f32.xlu1 %v543_v27  ;;  %v484_v29 = vpop.f32.mrb[6].mxu0  ;;  %v530_v30 = vpop.f32.mrb[6].mxu1  ;;  %v597_v28 = vld [vmem:[#allocation3] sm:$0xff] }
 0x101   : > { %v1409_v31 = vpop.f32.mrb[7].mxu0  ;;  %v1415_v32 = vpop.f32.mrb[7].mxu1 }
 0x102   : > { %v598_v31 = vld [vmem:[#allocation3 + $0x8] sm:$0xff] }
 0x104   : > { %547 = vmax.xlane.f32.xlu1 %v546_v33 }
 0x185   : > { %v539_v36 = vpop.xlane.xlu0 %538 }
 0x186   : > { %v1792_v37 = vmax.f32 %v1789_v35, %v539_v36 }
 0x188   : > { %v553_v39 = vsub.f32 %v1789_v35, %v1792_v37  ;;  %851 = vst.msk [vmem:[#allocation2] sm:$0xff] %vm322_vm2, %v1792_v37  ;;  %567 = vperm.xlu0 %1519, %v1792_v37   ;;  %v599_v35 = vld [vmem:[#allocation3 + $0x10] sm:$0xff] }
 0x189   : > { %v542_v40 = vpop.xlane.xlu0 %541 }
 0x18a   : > { %v1802_v41 = vmax.f32 %v1794_v38, %v542_v40 }
 0x18c   : > { %v554_v43 = vsub.f32 %v1794_v38, %v1802_v41  ;;  %852 = vst.msk [vmem:[#allocation2 + $0x8] sm:$0xff] %vm322_vm2, %v1802_v41  ;;  %572 = vperm.xlu1 %1520, %v1802_v41  }
 0x18d   : > { %v545_v44 = vpop.xlane.xlu1 %544 }
 0x18e   : > { %v1812_v45 = vmax.f32 %v1804_v42, %v545_v44  ;;  %v559_v21 = vmul.f32 1.442695, %v554_v43 }
 0x190   : > { %v555_v47 = vsub.f32 %v1804_v42, %v1812_v45  ;;  %853 = vst.msk [vmem:[#allocation2 + $0x10] sm:$0xff] %vm322_vm2, %v1812_v45  ;;  %577 = vperm.xlu1 %1520, %v1812_v45  }
 0x191   : > { %v548_v48 = vpop.xlane.xlu1 %547 }
 0x192   : > { %v1822_v49 = vmax.f32 %v1814_v46, %v548_v48  ;;  %v561_v22 = vmul.f32 1.442695, %v555_v47 }
 0x194   : > { %v556_v50 = vsub.f32 %v1814_v46, %v1822_v49  ;;  %854 = vst.msk [vmem:[#allocation2 + $0x18] sm:$0xff] %vm322_vm2, %v1822_v49  ;;  %582 = vperm.xlu1 %1520, %v1822_v49   ;;  %v1353_v49 = vld [vmem:[%s1957_s3 + $0x8] sm:$0xff] }
 0x207   : > { %v568_v59 = vpop.permute.xlu0 %567 }
 0x208   : > { %v585_v60 = vsub.f32 %v1773_v14, %v568_v59 }
 0x20a   : > { %v589_v61 = vmul.f32 1.442695, %v585_v60 }
 0x20b   : > { %v573_v62 = vpop.permute.xlu1 %572 }
 0x20c   : > { %1521 = vpow2.f32 %v589_v61  ;;  %v586_v63 = vsub.f32 %v1775_v15, %v573_v62  ;;  %v557_v15 = vmul.f32 1.442695, %v553_v39  ;;  %v600_v39 = vld [vmem:[#allocation3 + $0x18] sm:$0xff] }
 0x20e   : > { %v591_v1 = vmul.f32 1.442695, %v586_v63 }
 0x20f   : > { %v578_v2 = vpop.permute.xlu1 %577 }
 0x210   : > { %1523 = vpow2.f32 %v591_v1  ;;  %v587_v3 = vsub.f32 %v1781_v24, %v578_v2  ;;  %v563_v24 = vmul.f32 1.442695, %v556_v50  ;;  %v894_v50 = vld [vmem:[%s1957_s3] sm:$0xff] }
 0x212   : > { %v593_v4 = vmul.f32 1.442695, %v587_v3  ;;  %v628_v3 = vld [vmem:[#allocation4 + $0x10] sm:$0xff] }
 0x213   : > { %v583_v5 = vpop.permute.xlu1 %582 }
 0x214   : > { %1525 = vpow2.f32 %v593_v4  ;;  %v588_v6 = vsub.f32 %v1783_v25, %v583_v5 }
 0x216   : > { %v1522_v7 = vpop.eup %1521  ;;  %v595_v8 = vmul.f32 1.442695, %v588_v6 }
 0x217   : > { %v605_v9 = vsel %vm331_vm0, %v1522_v7, 0.0  ;;  %v654_v10 = vpack.c.bf16 %v1522_v7, %v1522_v7 }
 0x218   : > { %1527 = vpow2.f32 %v595_v8  ;;  %606 = vadd.xlane.f32.xlu0 %v605_v9 }
 0x219   : > { %1419 = vmatmul.mubr.msk.bf16.vlgmr.msra.gmra.mrb[8].mxu0 %vm331_vm0, %v654_v10  ;;  %1529 = vpow2.f32 %v557_v15  ;;  %v629_v10 = vld [vmem:[#allocation4 + $0x18] sm:$0xff] }
 0x21a   : > { %v1524_v11 = vpop.eup %1523  ;;  %1429 = vmatpush3.bf16.msra.mxu0 %v755_v56  ;;  %1430 = vmatprep.mubr.msk.bf16.mxu0 %vm1626_vm1, %v1625_v0  ;;  %1531 = vpow2.f32 %v559_v21 }
 0x21b   : > { %v608_v12 = vsel %vm331_vm0, %v1524_v11, 0.0  ;;  %v655_v13 = vpack.c.bf16 %v1524_v11, %v1524_v11  ;;  %1440 = vmatprep.subr.mxu0 %v1625_v0  ;;  %1533 = vpow2.f32 %v561_v22 }
 0x21c   : > { %609 = vadd.xlane.f32.xlu1 %v608_v12  ;;  %1535 = vpow2.f32 %v563_v24 }
 0x21d   : > { %1425 = vmatmul.mubr.msk.bf16.vlgmr.msra.gmra.mrb[8].mxu1 %vm331_vm0, %v655_v13 }
 0x21e   : > { %v1526_v14 = vpop.eup %1525  ;;  %1435 = vmatpush3.bf16.msra.mxu1 %v801_v58  ;;  %1436 = vmatprep.mubr.msk.bf16.mxu1 %vm1626_vm1, %v1625_v0  ;;  %v627_v58 = vld [vmem:[#allocation4 + $0x8] sm:$0xff] }
 0x21f   : > { %v611_v16 = vsel %vm331_vm0, %v1526_v14, 0.0  ;;  %v656_v17 = vpack.c.bf16 %v1526_v14, %v1526_v14  ;;  %1445 = vmatprep.subr.mxu1 %v1625_v0 }
 0x220   : > { %612 = vadd.xlane.f32.xlu1 %v611_v16 }
 0x221   : > { %1431 = vmatmul.mubr.msk.bf16.vlgmr.msra.gmra.mrb[12].mxu0 %vm331_vm0, %v656_v17 }
 0x222   : > { %v1528_v18 = vpop.eup %1527  ;;  %1442 = vmatprep.mubr.msk.f32.mxu0 %vm1626_vm1, %v1625_v0  ;;  %1441 = vmatpush3.msra.mxu0 %v1353_v49 }
 0x223   : > { %v614_v19 = vsel %vm331_vm0, %v1528_v18, 0.0  ;;  %v657_v20 = vpack.c.bf16 %v1528_v18, %v1528_v18  ;;  %v1530_v23 = vpop.eup %1529  ;;  %1450 = vmatprep.subr.mxu0 %v1625_v0 }
 0x224   : > { %615 = vadd.xlane.f32.xlu1 %v614_v19  ;;  %v1532_v25 = vpop.eup %1531  ;;  %v601_v29 = vmul.f32 %v1530_v23, %v597_v28 }
 0x225   : > { %1437 = vmatmul.mubr.msk.bf16.vlgmr.msra.gmra.mrb[12].mxu1 %vm331_vm0, %v657_v20  ;;  %v1534_v26 = vpop.eup %1533  ;;  %v602_v33 = vmul.f32 %v1532_v25, %v598_v31 }
 0x226   : > { %1447 = vmatprep.mubr.msk.f32.mxu1 %vm1626_vm1, %v1625_v0  ;;  %v1536_v27 = vpop.eup %1535  ;;  %v603_v37 = vmul.f32 %v1534_v26, %v599_v35  ;;  %1446 = vmatpush3.msra.mxu1 %v894_v50 }
 0x227   : > { %v604_v42 = vmul.f32 %v1536_v27, %v600_v39  ;;  %1455 = vmatprep.subr.mxu1 %v1625_v0 }
 0x22e   : > { %632 = vperm.xlu0 %1519, %v1530_v23  }
 0x235   : > { %637 = vperm.xlu1 %1520, %v1532_v25  }
 0x239   : > { %642 = vperm.xlu1 %1520, %v1534_v26   ;;  %v1358_v26 = vld [vmem:[%s1957_s3 + $0x18] sm:$0xff] }
 0x23d   : > { %647 = vperm.xlu1 %1520, %v1536_v27  }
 0x2a5   : > { %v607_v30 = vpop.xlane.xlu0 %606 }
 0x2a6   : > { %v617_v32 = vadd.f32 %v607_v30, %v601_v29  ;;  %v1356_v30 = vld [vmem:[%s1957_s3 + $0x10] sm:$0xff] }
 0x2a8   : > { %622 = vst.msk [vmem:[#allocation3] sm:$0xff] %vm322_vm2, %v617_v32 }
 0x2a9   : > { %v610_v34 = vpop.xlane.xlu1 %609 }
 0x2aa   : > { %v618_v36 = vadd.f32 %v610_v34, %v602_v33 }
 0x2ac   : > { %623 = vst.msk [vmem:[#allocation3 + $0x8] sm:$0xff] %vm322_vm2, %v618_v36 }
 0x2ad   : > { %v613_v38 = vpop.xlane.xlu1 %612  ;;  %v633_v55 = vpop.permute.xlu0 %632 }
 0x2ae   : > { %v619_v40 = vadd.f32 %v613_v38, %v603_v37  ;;  %v650_v57 = vmul.f32 %v633_v55, %v626_v54 }
 0x2af   : > { %v862_v41 = vld [vmem:[#allocation3] sm:$0xff] }
 0x2b0   : > { %624 = vst.msk [vmem:[#allocation3 + $0x10] sm:$0xff] %vm322_vm2, %v619_v40  ;;  %1537 = vrcp.f32 %v862_v41 }
 0x2b1   : > { %v616_v43 = vpop.xlane.xlu1 %615 }
 0x2b2   : > { %v620_v44 = vadd.f32 %v616_v43, %v604_v42 }
 0x2b3   : > { %v863_v45 = vld [vmem:[#allocation3 + $0x8] sm:$0xff] }
 0x2b4   : > { %625 = vst.msk [vmem:[#allocation3 + $0x18] sm:$0xff] %vm322_vm2, %v620_v44  ;;  %1539 = vrcp.f32 %v863_v45  ;;  %v1360_v45 = vld [vmem:[%s1958_s4] ss:$0 sm:$0xff] }
 0x2b5   : > { %v638_v56 = vpop.permute.xlu1 %637 }
 0x2b6   : > { %v651_v1 = vmul.f32 %v638_v56, %v627_v58 }
 0x2b7   : > { %v864_v46 = vld [vmem:[#allocation3 + $0x10] sm:$0xff] }
 0x2b8   : > { %1541 = vrcp.f32 %v864_v46 }
 0x2b9   : > { %v643_v62 = vpop.permute.xlu1 %642 }
 0x2ba   : > { %v1538_v47 = vpop.eup %1537  ;;  %v652_v8 = vmul.f32 %v643_v62, %v628_v3 }
 0x2bb   : > { %872 = vperm.xlu0 %1519, %v1538_v47   ;;  %v865_v48 = vld [vmem:[#allocation3 + $0x18] sm:$0xff] }
 0x2bc   : > { %1543 = vrcp.f32 %v865_v48 }
 0x2bd   : > { %v648_v11 = vpop.permute.xlu1 %647 }
 0x2be   : > { %v1540_v51 = vpop.eup %1539  ;;  %v653_v16 = vmul.f32 %v648_v11, %v629_v10 }
 0x2bf   : > { %877 = vperm.xlu1 %1520, %v1540_v51  }
 0x2c2   : > { %v1542_v52 = vpop.eup %1541 }
 0x2c3   : > { %882 = vperm.xlu1 %1520, %v1542_v52  }
 0x2c6   : > { %v1544_v53 = vpop.eup %1543 }
 0x2c7   : > { %887 = vperm.xlu0 %1519, %v1544_v53  }
 0x2ec   : > { %v699_v59 = vpop.f32.mrb[8].mxu0 }
 0x2ed   : > { %v843_v60 = vadd.f32 %v699_v59, %v650_v57  ;;  %v1420_v61 = vpop.f32.mrb[9].mxu0 }
 0x2ee   : > { %v702_v63 = vpop.f32.mrb[10].mxu0 }
 0x2ef   : > { %847 = vst.msk [vmem:[#allocation4] sm:$0xff] %vm331_vm0, %v843_v60  ;;  %v1421_v2 = vpop.f32.mrb[11].mxu0 }
 0x2f0   : > { %v745_v4 = vpop.f32.mrb[8].mxu1 }
 0x2f1   : > { %v844_v5 = vadd.f32 %v745_v4, %v651_v1  ;;  %v1426_v6 = vpop.f32.mrb[9].mxu1 }
 0x2f2   : > { %v748_v7 = vpop.f32.mrb[10].mxu1 }
 0x2f3   : > { %848 = vst.msk [vmem:[#allocation4 + $0x8] sm:$0xff] %vm331_vm0, %v844_v5  ;;  %v1427_v9 = vpop.f32.mrb[11].mxu1 }
 0x2f4   : > { %v791_v12 = vpop.f32.mrb[12].mxu0 }
 0x2f5   : > { %v845_v13 = vadd.f32 %v791_v12, %v652_v8  ;;  %v1432_v14 = vpop.f32.mrb[13].mxu0 }
 0x2f6   : > { %v794_v15 = vpop.f32.mrb[14].mxu0  ;;  %v858_v24 = vld [vmem:[#allocation4] sm:$0xff] }
 0x2f7   : > { %849 = vst.msk [vmem:[#allocation4 + $0x10] sm:$0xff] %vm331_vm0, %v845_v13  ;;  %v1433_v17 = vpop.f32.mrb[15].mxu0 }
 0x2f8   : > { %v837_v18 = vpop.f32.mrb[12].mxu1 }
 0x2f9   : > { %v846_v19 = vadd.f32 %v837_v18, %v653_v16  ;;  %v1438_v20 = vpop.f32.mrb[13].mxu1 }
 0x2fa   : > { %v840_v21 = vpop.f32.mrb[14].mxu1  ;;  %v859_v27 = vld [vmem:[#allocation4 + $0x8] sm:$0xff] }
 0x2fb   : > { %850 = vst.msk [vmem:[#allocation4 + $0x18] sm:$0xff] %vm331_vm0, %v846_v19  ;;  %v1439_v22 = vpop.f32.mrb[15].mxu1 }
 0x2fe   : > { %v860_v32 = vld [vmem:[#allocation4 + $0x10] sm:$0xff] }
 0x302   : > { %v861_v35 = vld [vmem:[#allocation4 + $0x18] sm:$0xff] }
 0x33a   : > { %v873_v23 = vpop.permute.xlu0 %872 }
 0x33b   : > { %v890_v25 = vmul.f32 %v873_v23, %v858_v24 }
 0x33d   : > { %1448 = vmatmul.mubr.msk.f32.vlgmr.msra.gmra.mrb[16].mxu1 %vm331_vm0, %v890_v25 }
 0x33e   : > { %v878_v28 = vpop.permute.xlu1 %877  ;;  %1456 = vmatpush3.msra.mxu1 %v1358_v26  ;;  %1457 = vmatprep.mubr.msk.f32.mxu1 %vm1626_vm1, %v1625_v0 }
 0x33f   : > { %v891_v29 = vmul.f32 %v878_v28, %v859_v27 }
 0x341   : > { %1443 = vmatmul.mubr.msk.f32.vlgmr.msra.gmra.mrb[16].mxu0 %vm331_vm0, %v891_v29 }
 0x342   : > { %v883_v31 = vpop.permute.xlu1 %882  ;;  %1451 = vmatpush3.msra.mxu0 %v1356_v30  ;;  %1452 = vmatprep.mubr.msk.f32.mxu0 %vm1626_vm1, %v1625_v0 }
 0x343   : > { %v892_v33 = vmul.f32 %v883_v31, %v860_v32 }
 0x345   : > { %1453 = vmatmul.mubr.msk.f32.vlgmr.msra.gmra.mrb[18].mxu0 %vm331_vm0, %v892_v33 }
 0x346   : > { %v888_v34 = vpop.permute.xlu0 %887 }
 0x347   : > { %v893_v36 = vmul.f32 %v888_v34, %v861_v35 }
 0x349   : > { %1458 = vmatmul.mubr.msk.f32.vlgmr.msra.gmra.mrb[18].mxu1 %vm331_vm0, %v893_v36 }
 0x410   : > { %v1039_v37 = vpop.f32.mrb[16].mxu1 }
 0x411   : > { %v1449_v38 = vpop.f32.mrb[17].mxu1 }
 0x414   : > { %v966_v39 = vpop.f32.mrb[16].mxu0 }
 0x415   : > { %v1040_v40 = vadd.f32 %v1039_v37, %v966_v39  ;;  %v1444_v41 = vpop.f32.mrb[17].mxu0 }
 0x418   : > { %v1114_v42 = vpop.f32.mrb[18].mxu0 }
 0x419   : > { %v1118_v43 = vadd.f32 %v1114_v42, %v1040_v40  ;;  %v1454_v44 = vpop.f32.mrb[19].mxu0 }
 0x41c   : > { %v1190_v0 = vpop.f32.mrb[18].mxu1 }
 0x41d   : > { %v1194_v46 = vadd.f32 %v1190_v0, %v1118_v43  ;;  %v1459_v47 = vpop.f32.mrb[19].mxu1 }
 0x41f   : > { %v1202_v48 = vadd.f32 %v1360_v45, %v1194_v46 }
 0x421   : > { %1204 = vst.msk [vmem:[%s292_s16] sm:$0xff] %vm1203_vm4, %v1202_v48 }
 0x422   : > { %1558 = shalt.err (!%p1555_p5)
}
 0x423   : > { %s1559_s10 = scalar_lea.hbm %s1907_s27, 128  ;;  %s1563_s13 = scalar_lea.hbm %s1959_s5, 256 }
 0x424   : > { %p1560_p6 = scmp.ne.s32.totalorder %s1907_s27, %s1559_s10  ;;  %p1564_p10 = scmp.lt.u32.totalorder %s1907_s27, %s1959_s5 }
 0x425   : > { %p1565_p11 = scmp.lt.u32.totalorder %s1563_s13, %s1559_s10  ;;  %p1567_p13 = scmp.lt.u32.totalorder %s1559_s10, %s1907_s27 }
 0x426   : > { %p1561_p7 = pnand %p1560_p6, %p1700_p4 }
 0x427   : > { %p1566_p12 = por %p1565_p11, %p1564_p10 }
 0x428   : > { %p1562_p9 = pneg %p1561_p7 }
 0x429   : > { %p1568_p0 = por %p1567_p13, %p1566_p12 }
 0x42b   : > { %p1569_p1 = pnand %p1568_p0, %p1562_p9 }
 0x42d   : > { %1572 = shalt.err (!%p1569_p1)
}
 0x42e   : > { %1460 = dma.vmem_to_hbm [thread:$0]  (%p1700_p4), %s1909_s17, 128, %s1907_s27, %s1206_s29  }
 0x42f PF: > { %p1466_p2 = scmp.ge.s32.totalorder %s1623_s23, 2  ;;  %s1232_s16 = sand.u32 1, %s1603_s18  }
 0x430   : > { %s1233_s24 = scalar_lea.sflag [#allocation6], %s1232_s16 }
 0x431   : > { %p1463_p3 = pnand %p1466_p2, %p1707_p8 }
 0x433   : > { %1598 = dma.done.wait (!%p1463_p3), %s1233_s24, 128  }
 0x434   : > { %1600 = vsyncadd (!%p1463_p3), %s1233_s24, 4294967168  ;;  %s18_s23 = sadd.s32 1, %s1623_s23   ;;  %s1962_s18 = smov %s1607_s19 }
 0x435   : > { %p15_p5 = scmp.ge.s32.totalorder %s18_s23, 4   ;;  %s1963_s19 = smov %s1611_s20 }
 0x436   : > { %s1964_s20 = smov %s1713_s6  ;;  %s1965_s21 = smov %s1619_s22 }
 0x437   : > { %s1966_s22 = smov %s1968_s26  ;;  %17 = sbr.rel (!%p15_p5) target bundleno = 4 (0x4), region = 92 }
 0x43e   :  { %1238 = vsyncpa [#allocation6], 1 }
 0x43f   :  { %1240 = vsyncpa [#allocation6 + $0x1], 1 }

</bundles_post_ra>
